<compile_context>
chip_gen: v6e
topology: v6e:2x2x1
jax: 0.10.0
libtpu: 0.0.40
codegen_flags: <defaults>
</compile_context>

<pallas_src>
import math

import jax
import jax.numpy as jnp
from jax.experimental import pallas as pl
from jax.experimental.pallas import tpu as pltpu

CENSOR_DIM = 1                              # mirrors AbstractCensorship(dim=1)
_TARGET_BLOCK_BYTES = 4 * 1024 * 1024       # ~4 MiB/block -> ~16 MiB pipelined footprint
_VMEM_LIMIT_BYTES = 48 * 1024 * 1024        # explicit scoped limit (< 64 MiB v7x physical)
_LANE_CAP = 32768                           # max flattened-row width (elements)


def _make_censor_kernel(censor_fn):
    def kernel(x_ref, o_ref):
        # Placeholder for the (abstract) censoring op; identity for the base.
        o_ref[...] = censor_fn(x_ref[...]).astype(o_ref.dtype)
    return kernel


def _pick_layout(shape, sublane_mult):
    """Factor the flattened tensor into a lane-dense (rows, cols) 2D view."""
    total = math.prod(shape)
    if total % 128 == 0:
        # Prefer a factorization that leaves >= 2*sublane_mult rows so the row
        # grid can have >= 2 steps (v7x: one per TensorCore); search for the
        # largest cols that is a multiple of 128, divides total, <= _LANE_CAP.
        for want_rows in (2 * sublane_mult, 1):
            if total // want_rows < 128:
                continue
            c = (min(_LANE_CAP, total // want_rows) // 128) * 128
            while c >= 128:
                if total % c == 0:
                    return total // c, c
                c -= 128
    # Fallback (no 128-multiple factorization): flatten dims >= 2 into the lane
    # axis (H*W for NCHW); the column axis gets tiled if it is too wide.
    if len(shape) > 2:
        cols = math.prod(shape[2:])
    elif len(shape) == 2:
        cols = shape[-1]
    else:
        cols = total
    return total // cols, cols


def _pick_blocks(rows, cols, itemsize, sublane_mult):
    # Column block: a multiple of 128 lanes, or the full extent (always legal).
    if cols < 128 or cols * itemsize * sublane_mult <= _TARGET_BLOCK_BYTES:
        block_cols = cols
    else:
        block_cols = max(
            128, (_TARGET_BLOCK_BYTES // (sublane_mult * itemsize)) // 128 * 128)
        block_cols = min(block_cols, (cols // 128) * 128)
    # Row block: multiple of the dtype sublane packing (8 f32 / 16 bf16 /
    # 32 int8), or the full extent.
    block_rows = max(1, _TARGET_BLOCK_BYTES // (block_cols * itemsize))
    block_rows = max(sublane_mult, (block_rows // sublane_mult) * sublane_mult)
    block_rows = min(block_rows, rows)
    # Ensure the parallel row axis has >= 2 steps when possible (v7x: 2 TCs).
    if block_rows == rows and rows >= 2 * sublane_mult:
        block_rows = max(sublane_mult, (rows // 2 // sublane_mult) * sublane_mult)
    return block_rows, block_cols


def apply_censorship(x: jax.Array, censor_fn) -> jax.Array:
    """Streaming Pallas template a concrete Censorship subclass specializes."""
    shape = x.shape
    itemsize = jnp.dtype(x.dtype).itemsize
    sublane_mult = max(8, 32 // itemsize)        # 8 f32, 16 bf16, 32 int8/fp8
    rows, cols = _pick_layout(shape, sublane_mult)
    block_rows, block_cols = _pick_blocks(rows, cols, itemsize, sublane_mult)

    grid = (pl.cdiv(rows, block_rows), pl.cdiv(cols, block_cols))
    spec = pl.BlockSpec((block_rows, block_cols), lambda i, j: (i, j))

    out2 = pl.pallas_call(
        _make_censor_kernel(censor_fn),
        out_shape=jax.ShapeDtypeStruct((rows, cols), x.dtype),
        grid=grid,
        in_specs=[spec],
        out_specs=spec,
        cost_estimate=pl.CostEstimate(
            flops=0,
            transcendentals=0,
            bytes_accessed=2 * x.size * itemsize,
        ),
        compiler_params=pltpu.CompilerParams(
            dimension_semantics=("parallel", "parallel"),
            vmem_limit_bytes=_VMEM_LIMIT_BYTES,
        ),
    )(x.reshape(rows, cols))

    return out2.reshape(shape)


def abstract_censorship(x: jax.Array, censor_fn=None) -> jax.Array:
    """Pallas equivalent of AbstractCensorship.forward.

    The abstract base performs no censoring, so it is a zero-cost identity
    (no kernel launch).  Concrete subclasses pass `censor_fn` and run through
    the streaming Pallas template above.
    """
    if censor_fn is None:
        return x
    return apply_censorship(x, censor_fn)


if __name__ == "__main__":
    key = jax.random.PRNGKey(0)
    # Small NCHW input consistent with what a concrete Censorship subclass
    # (censoring along dim=1) would receive.
    x = jax.random.normal(key, (2, 4, 16, 16), dtype=jnp.float32)

    # Abstract base: zero-cost pass-through, no kernel launch.
    y0 = abstract_censorship(x)
    assert y0 is x

    # Exercise the streaming Pallas template with an identity "censor".
    y = apply_censorship(x, lambda v: v)
    y = jax.block_until_ready(y)

    assert y.shape == x.shape and y.dtype == x.dtype
    assert jnp.allclose(y, x), "identity pass-through mismatch"
    print("KERNEL_OK")
</pallas_src>

<mosaic_0001>
module attributes {stable_mosaic.version = 11 : i64} {
  func.func @kernel(%arg0: i32, %arg1: i32, %arg2: memref<8x128xf32, #tpu.memory_space<vmem>>, %arg3: memref<8x128xf32, #tpu.memory_space<vmem>>) attributes {dimension_semantics = [#tpu.dimension_semantics<parallel>, #tpu.dimension_semantics<parallel>], iteration_bounds = array<i64: 2, 1>, scalar_prefetch = 0 : i64, scratch_operands = 0 : i64, tpu.core_type = #tpu.core_type<tc>, window_params = [{transform_indices = @transform_0, window_bounds = array<i64: 8, 128>}, {transform_indices = @transform_1, window_bounds = array<i64: 8, 128>}]} {
    %c0 = arith.constant 0 : index
    %c0_0 = arith.constant 0 : index
    %0 = vector.load %arg2[%c0, %c0_0] : memref<8x128xf32, #tpu.memory_space<vmem>>, vector<8x128xf32>
    %c0_1 = arith.constant 0 : index
    %c0_2 = arith.constant 0 : index
    %1 = vector.load %arg3[%c0_1, %c0_2] : memref<8x128xf32, #tpu.memory_space<vmem>>, vector<8x128xf32>
    tpu.vector_store %arg3[%c0_1, %c0_2], %0 {strides = array<i32>} : memref<8x128xf32, #tpu.memory_space<vmem>>, vector<8x128xf32>,
    return
  }
  func.func @transform_0(%arg0: i32, %arg1: i32) -> (i32, i32) {
    %c0_i32 = arith.constant 0 : i32
    return %arg0, %arg1 : i32, i32
  }
  func.func @transform_1(%arg0: i32, %arg1: i32) -> (i32, i32) {
    %c0_i32 = arith.constant 0 : i32
    return %arg0, %arg1 : i32, i32
  }
}

</mosaic_0001>

<bundles_post_ra>
// kernel: tpu_custom_call.1
= control target key start
LH: loop header
LB: loop body
LE: loop exit
PB: predicated region body
PF: predicated region fallthrough
CT: control target
= control target key end

     0   :  { %6 = vsyncpa [#allocation3], 0  ;;  %s583_s0 = inlined_call_operand.hbm [shape: f32[16,128], index: 0, kind: input, shape index: {}]   ;;  %s584_s1 = inlined_call_operand.hbm [shape: f32[16,128], index: 1, kind: output, shape index: {}]  }
   0x1   :  { %8 = vsyncpa [#allocation3 + $0x1], 0 }
   0x2   :  { %9 = vsyncpa [#allocation4], 0 }
   0x3   :  { %11 = vsyncpa [#allocation4 + $0x1], 0  ;;  %s443_s6 = smov 0   ;;  %s445_s7 = smov 0  }
   0x4   :  { %s447_s8 = smov 0   ;;  %s449_s9 = smov 0  }
   0x5   :  { %s451_s10 = smov 0   ;;  %s453_s11 = smov 0  }
   0x6 LB: > { %s246_s12 = sadd.s32 4294967295, %s429_s11   ;;  %s247_s13 = sadd.s32 4294967294, %s429_s11   ;;  %s429_s11 = sphi %s453_s11, %s17_s11   ;;  %s425_s10 = sphi %s451_s10, %s596_s10   ;;  %s421_s9 = sphi %s449_s9, %s595_s9   ;;  %s417_s8 = sphi %s447_s8, %s594_s8   ;;  %s413_s7 = sphi %s445_s7, %s593_s7   ;;  %s409_s6 = sphi %s443_s6, %s592_s6  }
   0x7   : > { %s29_s14 = sadd.s32 1, %s425_s10  ;;  %s38_s15 = sadd.s32 1, %s417_s8 }
   0x8   : > { %p31_p0 = scmp.ge.s32.totalorder %s29_s14, 2  ;;  %p45_p1 = scmp.ne.s32.totalorder %s417_s8, %s413_s7 }
   0x9   : > { %p46_p2 = scmp.eq.s32.totalorder %s429_s11, 0  ;;  %p51_p3 = scmp.ne.s32.totalorder %s413_s7, %s409_s6 }
   0xa   : > { %s598_s14 = smov (%p31_p0, %s29_s14), 0  ;;  %p52_p5 = scmp.eq.s32.totalorder %s246_s12, 0 }
   0xb   : > { %p484_p4 = por %p46_p2, %p45_p1  ;;  %s33_s17 = ssub.s32 %s425_s10, %s598_s14 }
   0xc   : > { %p77_p6 = scmp.eq.s32.totalorder %s246_s12, 1  ;;  %p36_p7 = scmp.eq.s32.totalorder %s33_s17, 0 }
   0xd   : > { %p490_p8 = por %p52_p5, %p51_p3  ;;  %p83_p10 = scmp.eq.s32.totalorder %s247_s13, 1 }
   0xe   : > { %p494_p9 = por %p77_p6, %p45_p1  ;;  %p271_p13 = scmp.lt.s32.totalorder %s429_s11, 2 }
   0xf   : > { %s499_s20 = scalar_select %p36_p7, %s417_s8, %s38_s15  }
  0x10   : > { %p501_p11 = por %p83_p10, %p51_p3  ;;  %s103_s22 = sand.u32 1, %s417_s8  }
  0x11   : > { %s250_s23 = sshll.u32 %s103_s22, 3  ;;  %s251_s24 = sshll.u32 %s425_s10, 7 }
  0x12   : > { %s588_s21 = scalar_select %p501_p11, 1, 0 }
  0x13   : > { %s113_s27 = scalar_lea.hbm %s583_s0, %s251_s24  ;;  %s107_s28 = scalar_lea.vmem [#allocation2], %s250_s23 }
  0x14   : > { %s115_s29 = sshll.u32 %s107_s28, 4  ;;  %p514_p0 = pnand %p271_p13, %p484_p4  ;;  %s116_s29 = int_to_ptr.vmem [resolvable:$true] %s115_s29 }
  0x15   : > { %p252_p1 = scmp.ge.s32.totalorder %s429_s11, 1  ;;  %p120_p2 = scmp.lt.s32.totalorder %s429_s11, 3 }
  0x16   : > { %s104_s2 = scalar_lea.sflag [#allocation3], %s103_s22  ;;  %p323_p3 = pneg %p514_p0 }
  0x17   : > { %s334_s3 = scalar_lea.vmem %s116_s29, 128  ;;  %s431_s4 = smov [#allocation2]  }
  0x18   : > { %p335_p5 = scmp.ne.s32.totalorder %s116_s29, %s334_s3  ;;  %s339_s5 = sshll.u32 %s431_s4, 4  ;;  %s340_s5 = int_to_ptr.vmem [resolvable:$false] %s339_s5 }
  0x19   : > { %s341_s12 = scalar_lea.vmem %s340_s5, 256  ;;  %p342_p10 = scmp.lt.s32.totalorder %s116_s29, %s340_s5 }
  0x1a   : > { %p337_p6 = pnand %p335_p5, %p323_p3  ;;  %p343_p12 = scmp.lt.s32.totalorder %s341_s12, %s334_s3 }
  0x1c   : > { %p338_p7 = pneg %p337_p6  ;;  %p344_p4 = por %p343_p12, %p342_p10 }
  0x1e   : > { %p345_p13 = pnand %p344_p4, %p338_p7 }
  0x20   : > { %348 = shalt.err (!%p345_p13)
}
  0x21   : > { %266 = dma.hbm_to_vmem [thread:$0]  (!%p514_p0), %s113_s27, 128, %s116_s29, %s104_s2  }
  0x22   : > { %p121_p11 = pnand %p252_p1, %p120_p2 }
  0x23   : > { %s529_s13 = sand.u32 (!%p121_p11), 1, %s413_s7  }
  0x24   : > { %124 = sbr.rel (%p121_p11) target bundleno = 66 (0x42), region = 24  ;;  %s253_s15 = sshll.u32 (!%p121_p11), %s529_s13, 3 }
  0x25   : > { %s127_s16 = scalar_lea.sflag (!%p121_p11), [#allocation3], %s529_s13  ;;  %s130_s17 = scalar_lea.vmem (!%p121_p11), [#allocation2], %s253_s15 }
  0x29   : > { %400 = dma.done.wait (%p490_p8), %s127_s16, 128  }
  0x2a   : > { %402 = vsyncadd (%p490_p8), %s127_s16, 4294967168  ;;  %s148_s22 = scalar_lea.vmem [#allocation5], %s253_s15  ;;  %s256_s24 = sshll.u32 %s421_s9, 7  ;;  %v149_v0 = vld [vmem:[%s130_s17] sm:$0xff] }
  0x2b   : > { %s166_s23 = sshll.u32 %s148_s22, 4  ;;  %s164_s27 = scalar_lea.hbm %s584_s1, %s256_s24  ;;  %150 = vst [vmem:[%s148_s22] sm:$0xff] %v149_v0  ;;  %s538_s23 = int_to_ptr.vmem [resolvable:$true] %s166_s23 }
  0x2c   : > { %s152_s28 = scalar_lea.sflag [#allocation4], %s529_s13  ;;  %s349_s18 = scalar_lea.vmem %s538_s23, 128 }
  0x2d   : > { %p350_p8 = scmp.ne.s32.totalorder %s538_s23, %s349_s18  ;;  %s432_s29 = smov [#allocation5]  }
  0x2e   : > { %s353_s30 = sshll.u32 %s432_s29, 4  ;;  %s354_s30 = int_to_ptr.vmem [resolvable:$false] %s353_s30 }
  0x2f   : > { %p351_p11 = pnand %p350_p8, %p494_p9  ;;  %s355_s9 = scalar_lea.vmem %s354_s30, 256 }
  0x30   : > { %p356_p0 = scmp.lt.s32.totalorder %s538_s23, %s354_s30  ;;  %p357_p1 = scmp.lt.s32.totalorder %s355_s9, %s349_s18 }
  0x31   : > { %p352_p12 = pneg %p351_p11 }
  0x32   : > { %p358_p2 = por %p357_p1, %p356_p0 }
  0x34   : > { %p359_p3 = pnand %p358_p2, %p352_p12 }
  0x36   : > { %362 = shalt.err (!%p359_p3)
}
  0x37   : > { %s363_s2 = scalar_lea.hbm %s164_s27, 128  ;;  %s367_s5 = scalar_lea.hbm %s584_s1, 256 }
  0x38   : > { %p364_p5 = scmp.ne.s32.totalorder %s164_s27, %s363_s2  ;;  %p368_p10 = scmp.lt.s32.totalorder %s164_s27, %s584_s1 }
  0x39   : > { %p369_p4 = scmp.lt.s32.totalorder %s367_s5, %s363_s2 }
  0x3a   : > { %p365_p6 = pnand %p364_p5, %p494_p9 }
  0x3b   : > { %p370_p13 = por %p369_p4, %p368_p10 }
  0x3c   : > { %p366_p7 = pneg %p365_p6 }
  0x3e   : > { %p371_p8 = pnand %p370_p13, %p366_p7 }
  0x40   : > { %374 = shalt.err (!%p371_p8)
}
  0x41   : > { %261 = dma.vmem_to_hbm [thread:$0]  (%p494_p9), %s538_s23, 128, %s164_s27, %s152_s28  }
  0x42 PF: > { %s178_s15 = sand.u32 1, %s409_s6   ;;  %p590_p11 = scmp.ne.s32.totalorder %s588_s21, 0 }
  0x43   : > { %p591_p12 = scmp.ge.s32.totalorder %s429_s11, 2  ;;  %s179_s16 = scalar_lea.sflag [#allocation4], %s178_s15 }
  0x45   : > { %p268_p0 = pnand %p591_p12, %p590_p11 }
  0x47   : > { %p269_p1 = pneg %p268_p0 }
  0x49   : > { %404 = dma.done.wait (%p269_p1), %s179_s16, 128  }
  0x4a   : > { %406 = vsyncadd (%p269_p1), %s179_s16, 4294967168  ;;  %s17_s11 = sadd.s32 1, %s429_s11   ;;  %s592_s6 = smov %s413_s7 }
  0x4b   : > { %p14_p2 = scmp.ge.s32.totalorder %s17_s11, 4   ;;  %s593_s7 = smov %s417_s8 }
  0x4c   : > { %s594_s8 = smov %s499_s20  ;;  %s595_s9 = smov %s425_s10 }
  0x4d   : > { %s596_s10 = smov %s598_s14  ;;  %16 = sbr.rel (!%p14_p2) target bundleno = 6 (0x6), region = 69 }
  0x52   :  { %184 = vsyncpa [#allocation3], 1 }
  0x53   :  { %186 = vsyncpa [#allocation3 + $0x1], 1 }
  0x54   :  { %187 = vsyncpa [#allocation4], 1 }
  0x55   :  { %189 = vsyncpa [#allocation4 + $0x1], 1 }

</bundles_post_ra>
